<compile_context>
chip_gen: v5e
topology: v5e:2x2
jax: 0.10.0
libtpu: 0.0.40
codegen_flags: <defaults>
</compile_context>

<pallas_src>
import functools

import jax
import jax.numpy as jnp
from jax import lax
from jax.experimental import pallas as pl
from jax.experimental.pallas import tpu as pltpu


def _lm_criterion_kernel(x_ref, aux_ref, out_ref, *, n_rows):
    """One grid step: reduce a (row_tile, v_tile) slab to partial (num, den)."""
    i = pl.program_id(0)          # row-tile index   ("parallel")
    j = pl.program_id(1)          # vocab-tile index ("arbitrary", usually 1 tile)

    x = x_ref[...]                # (TN, TV) log-probs, NATIVE dtype (no slab upcast)
    aux = aux_ref[...]            # (TN, 2) f32: lane 0 = target, lane 1 = mask
    tgt = aux[:, 0:1].astype(jnp.int32)   # (TN, 1), exact for V < 2^24
    msk = aux[:, 1:2]                     # (TN, 1) f32

    tn, tv = x.shape

    # Row validity for the ragged tail block: garbage rows past N (possibly NaN/Inf)
    # are excluded with a select, never via mask*garbage.
    row_ids = lax.broadcasted_iota(jnp.int32, (tn, 1), 0) + i * tn
    valid = row_ids < n_rows

    # gather(1, target) restricted to this vocab tile: one-hot lane compare in the
    # native dtype + f32 row reduce (exact, <=1 nonzero element per row).
    cols = lax.broadcasted_iota(jnp.int32, (tn, tv), 1) + j * tv
    sel = jnp.where(cols == tgt, x, jnp.zeros((), x.dtype))
    x_at_tgt = jnp.sum(sel, axis=1, keepdims=True, dtype=jnp.float32)   # (TN, 1)

    num_part = jnp.sum(jnp.where(valid, -x_at_tgt * msk, 0.0))
    den_part = jnp.sum(jnp.where(valid, msk, 0.0))

    # Single lane-dense partial slab: num replicated in lanes 0-63, den in 64-127.
    # Unmasked full-vreg store; accumulate across the vocab-tile axis.
    lane = lax.broadcasted_iota(jnp.int32, out_ref.shape, 2)

    @pl.when(j == 0)
    def _():
        out_ref[...] = jnp.where(lane < 64, num_part, den_part)

    @pl.when(j > 0)
    def _():
        out_ref[...] += jnp.where(lane < 64, num_part, 0.0)   # den counted once


def language_model_criterion(inp, target, mask):
    """Pallas equivalent of LanguageModelCriterion2.forward(input, target, mask)."""
    B, T, V = inp.shape
    # The PyTorch module assumes target/mask already match input's (B, T).
    assert target.size == B * T, "target must have B*T elements"
    assert mask.size == B * T, "mask must have B*T elements"

    x = inp.reshape(-1, V)                               # stream in native dtype
    N = x.shape[0]
    # Pack target + mask into one lane-denser float32 stream (target exact < 2^24).
    aux = jnp.stack(
        [target.reshape(-1).astype(jnp.float32),
         mask.reshape(-1).astype(jnp.float32)], axis=-1)  # (N, 2)

    itemsize = jnp.dtype(x.dtype).itemsize
    mult = 16 if itemsize < 4 else 8                     # sublane packing multiple

    # Generation-aware sizing.
    try:
        vmem_cap = int(pltpu.get_tpu_info().vmem_capacity_bytes)
    except Exception:                                    # pragma: no cover
        vmem_cap = 128 << 20
    small_vmem = vmem_cap < (100 << 20)                  # v7x-class (64 MiB) part
    target_block_bytes = (10 << 20) if small_vmem else (16 << 20)

    row_bytes = V * itemsize
    if mult * row_bytes <= target_block_bytes:
        # Common case: full vocab per block, as many rows as the byte budget allows.
        v_tile = V
        rows = max(1, target_block_bytes // row_bytes)
        rows = min(rows, 4096)                           # bound aux lane-padding
        rows = max(mult, (rows // mult) * mult)
        rows = min(rows, pl.cdiv(N, mult) * mult)
    else:
        # Huge vocab: minimum rows, tile V in 128-lane multiples (2nd grid axis).
        rows = mult
        v_tile = max(128, (target_block_bytes // (mult * itemsize)) // 128 * 128)

    row_tile = rows
    grid_rows = pl.cdiv(N, row_tile)
    n_v = pl.cdiv(V, v_tile)

    x_block_bytes = row_tile * v_tile * itemsize
    aux_block_bytes = row_tile * 128 * 4                 # (row_tile, 2) lane-padded
    out_block_bytes = 8 * 128 * 4

    # Deeper x buffering on small-VMEM parts when the grid is long enough to benefit.
    x_buffers = 2
    if (small_vmem and grid_rows * n_v >= 4
            and 3 * x_block_bytes + 2 * aux_block_bytes + (4 << 20) <= (48 << 20)):
        x_buffers = 3

    # Exact VMEM budget from the real block sizes (+ slack), no artificial clamp.
    vmem_bytes = (x_buffers * x_block_bytes
                  + 2 * aux_block_bytes
                  + 2 * out_block_bytes
                  + (2 << 20))
    vmem_bytes = int(min(max(vmem_bytes, 4 << 20), vmem_cap * 3 // 4))

    x_spec_kwargs = {}
    if x_buffers != 2:
        x_spec_kwargs["pipeline_mode"] = pl.Buffered(x_buffers)
    x_spec = pl.BlockSpec((row_tile, v_tile), lambda i, j: (i, j), **x_spec_kwargs)
    aux_spec = pl.BlockSpec((row_tile, 2), lambda i, j: (i, 0))
    out_spec = pl.BlockSpec((1, 8, 128), lambda i, j: (i, 0, 0))

    kernel = functools.partial(_lm_criterion_kernel, n_rows=N)

    out_p = pl.pallas_call(
        kernel,
        out_shape=jax.ShapeDtypeStruct((grid_rows, 8, 128), jnp.float32),
        grid_spec=pltpu.PrefetchScalarGridSpec(
            num_scalar_prefetch=0,
            grid=(grid_rows, n_v),
            in_specs=[x_spec, aux_spec],
            out_specs=out_spec,
        ),
        compiler_params=pltpu.CompilerParams(
            dimension_semantics=("parallel", "arbitrary"),
            vmem_limit_bytes=vmem_bytes,
        ),
        cost_estimate=pl.CostEstimate(
            flops=3 * N * V,
            transcendentals=0,
            bytes_accessed=N * V * itemsize + N * 8 + grid_rows * 8 * 128 * 4,
        ),
    )(x, aux)

    num = jnp.sum(out_p[:, 0, 0])
    den = jnp.sum(out_p[:, 0, 64])
    return num / den                                     # NaN if mask sums to 0 (same as reference)


def _reference_loss(inp, target, mask):
    B, T, V = inp.shape
    x = inp.reshape(-1, V).astype(jnp.float32)
    t = target.reshape(-1)
    m = mask.reshape(-1).astype(jnp.float32)
    gathered = jnp.take_along_axis(x, t[:, None], axis=1)[:, 0]
    return jnp.sum(-gathered * m) / jnp.sum(m)


if __name__ == "__main__":
    key = jax.random.PRNGKey(0)
    k1, k2, k3 = jax.random.split(key, 3)

    B, T, V = 2, 8, 32
    logits = jax.random.normal(k1, (B, T, V), dtype=jnp.float32)
    log_probs = jax.nn.log_softmax(logits, axis=-1)          # "input" (log-probs)
    target = jax.random.randint(k2, (B, T), 0, V, dtype=jnp.int32)
    mask = (jax.random.uniform(k3, (B, T)) > 0.3).astype(jnp.float32)
    mask = mask.at[0, 0].set(1.0)                            # ensure mask.sum() > 0

    # float32 path
    loss = language_model_criterion(log_probs, target, mask)
    jax.block_until_ready(loss)
    ref = _reference_loss(log_probs, target, mask)
    assert jnp.allclose(loss, ref, rtol=1e-5, atol=1e-5), (loss, ref)

    # bfloat16 path (native-dtype streaming, no in-kernel slab upcast)
    lp_bf16 = log_probs.astype(jnp.bfloat16)
    loss_bf16 = language_model_criterion(lp_bf16, target, mask)
    jax.block_until_ready(loss_bf16)
    ref_bf16 = _reference_loss(lp_bf16, target, mask)
    assert jnp.allclose(loss_bf16, ref_bf16, rtol=1e-4, atol=1e-4), (loss_bf16, ref_bf16)

    print("KERNEL_OK")
</pallas_src>

<mosaic_0001>
module attributes {stable_mosaic.version = 11 : i64} {
  func.func @_lm_criterion_kernel(%arg0: i32, %arg1: i32, %arg2: memref<16x32xf32, #tpu.memory_space<vmem>>, %arg3: memref<16x2xf32, #tpu.memory_space<vmem>>, %arg4: memref<1x8x128xf32, #tpu.memory_space<vmem>>) attributes {dimension_semantics = [#tpu.dimension_semantics<parallel>, #tpu.dimension_semantics<arbitrary>], iteration_bounds = array<i64: 1, 1>, scalar_prefetch = 0 : i64, scratch_operands = 0 : i64, tpu.core_type = #tpu.core_type<tc>, window_params = [{transform_indices = @transform_0, window_bounds = array<i64: 16, 32>}, {transform_indices = @transform_1, window_bounds = array<i64: 16, 2>}, {transform_indices = @transform_2, window_bounds = array<i64: 1, 8, 128>}]} {
    %c0 = arith.constant 0 : index
    %c0_0 = arith.constant 0 : index
    %0 = vector.load %arg2[%c0, %c0_0] : memref<16x32xf32, #tpu.memory_space<vmem>>, vector<16x32xf32>
    %c0_1 = arith.constant 0 : index
    %c0_2 = arith.constant 0 : index
    %1 = vector.load %arg3[%c0_1, %c0_2] : memref<16x2xf32, #tpu.memory_space<vmem>>, vector<16x2xf32>
    %2 = vector.extract_strided_slice %1 {offsets = [0, 0], sizes = [16, 1], strides = [1, 1]} : vector<16x2xf32> to vector<16x1xf32>
    %3 = arith.fptosi %2 : vector<16x1xf32> to vector<16x1xi32>
    %4 = vector.extract_strided_slice %1 {offsets = [0, 1], sizes = [16, 1], strides = [1, 1]} : vector<16x2xf32> to vector<16x1xf32>
    %5 = tpu.iota {dimensions = array<i32: 0>} : vector<16x1xi32>
    %c16_i32 = arith.constant 16 : i32
    %6 = arith.muli %arg0, %c16_i32 : i32
    %7 = vector.broadcast %6 : i32 to vector<16x1xi32>
    %8 = arith.addi %5, %7 : vector<16x1xi32>
    %c16_i32_3 = arith.constant 16 : i32
    %9 = vector.broadcast %c16_i32_3 : i32 to vector<16x1xi32>
    %10 = arith.cmpi slt, %8, %9 : vector<16x1xi32>
    %11 = tpu.iota {dimensions = array<i32: 1>} : vector<16x32xi32>
    %c32_i32 = arith.constant 32 : i32
    %12 = arith.muli %arg1, %c32_i32 : i32
    %13 = vector.broadcast %12 : i32 to vector<16x32xi32>
    %14 = arith.addi %11, %13 : vector<16x32xi32>
    %15 = vector.broadcast %3 : vector<16x1xi32> to vector<16x32xi32>
    %16 = arith.cmpi eq, %14, %15 : vector<16x32xi32>
    %cst = arith.constant 0.000000e+00 : f32
    %17 = vector.broadcast %cst : f32 to vector<16x32xf32>
    %18 = arith.select %16, %0, %17 : vector<16x32xi1>, vector<16x32xf32>
    %cst_4 = arith.constant dense<0.000000e+00> : vector<16xf32>
    %19 = vector.multi_reduction <add>, %18, %cst_4 [1] : vector<16x32xf32> to vector<16xf32>
    %20 = vector.shape_cast %19 : vector<16xf32> to vector<16x1xf32>
    %cst_5 = arith.constant 0.000000e+00 : f32
    %21 = vector.broadcast %cst_5 : f32 to vector<16x1xf32>
    %22 = arith.subf %21, %20 : vector<16x1xf32>
    %23 = arith.mulf %22, %4 : vector<16x1xf32>
    %cst_6 = arith.constant 0.000000e+00 : f32
    %24 = vector.broadcast %cst_6 : f32 to vector<16x1xf32>
    %25 = arith.select %10, %23, %24 : vector<16x1xi1>, vector<16x1xf32>
    %26 = vector.shape_cast %25 : vector<16x1xf32> to vector<1x16x1xf32>
    %cst_7 = arith.constant dense<0.000000e+00> : vector<1xf32>
    %27 = vector.multi_reduction <add>, %26, %cst_7 [1, 2] : vector<1x16x1xf32> to vector<1xf32>
    %28 = vector.shape_cast %27 : vector<1xf32> to vector<1x1x1xf32>
    %29 = vector.extract %28[0, 0, 0] : f32 from vector<1x1x1xf32>
    %cst_8 = arith.constant 0.000000e+00 : f32
    %30 = vector.broadcast %cst_8 : f32 to vector<16x1xf32>
    %31 = arith.select %10, %4, %30 : vector<16x1xi1>, vector<16x1xf32>
    %32 = vector.shape_cast %31 : vector<16x1xf32> to vector<1x16x1xf32>
    %cst_9 = arith.constant dense<0.000000e+00> : vector<1xf32>
    %33 = vector.multi_reduction <add>, %32, %cst_9 [1, 2] : vector<1x16x1xf32> to vector<1xf32>
    %34 = vector.shape_cast %33 : vector<1xf32> to vector<1x1x1xf32>
    %35 = vector.extract %34[0, 0, 0] : f32 from vector<1x1x1xf32>
    %36 = tpu.iota {dimensions = array<i32: 2>} : vector<1x8x128xi32>
    %c0_i32 = arith.constant 0 : i32
    %37 = arith.cmpi eq, %arg1, %c0_i32 : i32
    %38 = arith.extui %37 : i1 to i32
    %c0_i32_10 = arith.constant 0 : i32
    %39 = arith.cmpi ne, %38, %c0_i32_10 : i32
    scf.if %39 {
      %c64_i32 = arith.constant 64 : i32
      %43 = vector.broadcast %c64_i32 : i32 to vector<1x8x128xi32>
      %44 = arith.cmpi slt, %36, %43 : vector<1x8x128xi32>
      %45 = vector.broadcast %29 : f32 to vector<1x8x128xf32>
      %46 = vector.broadcast %35 : f32 to vector<1x8x128xf32>
      %47 = arith.select %44, %45, %46 : vector<1x8x128xi1>, vector<1x8x128xf32>
      %c0_13 = arith.constant 0 : index
      %c0_14 = arith.constant 0 : index
      %c0_15 = arith.constant 0 : index
      %48 = vector.load %arg4[%c0_13, %c0_14, %c0_15] : memref<1x8x128xf32, #tpu.memory_space<vmem>>, vector<1x8x128xf32>
      tpu.vector_store %arg4[%c0_13, %c0_14, %c0_15], %47 {strides = array<i32>} : memref<1x8x128xf32, #tpu.memory_space<vmem>>, vector<1x8x128xf32>,
    } else {
    }
    %c0_i32_11 = arith.constant 0 : i32
    %40 = arith.cmpi sgt, %arg1, %c0_i32_11 : i32
    %41 = arith.extui %40 : i1 to i32
    %c0_i32_12 = arith.constant 0 : i32
    %42 = arith.cmpi ne, %41, %c0_i32_12 : i32
    scf.if %42 {
      %c0_13 = arith.constant 0 : index
      %c0_14 = arith.constant 0 : index
      %c0_15 = arith.constant 0 : index
      %43 = vector.load %arg4[%c0_13, %c0_14, %c0_15] : memref<1x8x128xf32, #tpu.memory_space<vmem>>, vector<1x8x128xf32>
      %c64_i32 = arith.constant 64 : i32
      %44 = vector.broadcast %c64_i32 : i32 to vector<1x8x128xi32>
      %45 = arith.cmpi slt, %36, %44 : vector<1x8x128xi32>
      %cst_16 = arith.constant 0.000000e+00 : f32
      %46 = vector.broadcast %29 : f32 to vector<1x8x128xf32>
      %47 = vector.broadcast %cst_16 : f32 to vector<1x8x128xf32>
      %48 = arith.select %45, %46, %47 : vector<1x8x128xi1>, vector<1x8x128xf32>
      %49 = arith.addf %43, %48 : vector<1x8x128xf32>
      %c0_17 = arith.constant 0 : index
      %c0_18 = arith.constant 0 : index
      %c0_19 = arith.constant 0 : index
      %50 = vector.load %arg4[%c0_17, %c0_18, %c0_19] : memref<1x8x128xf32, #tpu.memory_space<vmem>>, vector<1x8x128xf32>
      tpu.vector_store %arg4[%c0_17, %c0_18, %c0_19], %49 {strides = array<i32>} : memref<1x8x128xf32, #tpu.memory_space<vmem>>, vector<1x8x128xf32>,
    } else {
    }
    return
  }
  func.func @transform_0(%arg0: i32, %arg1: i32) -> (i32, i32) {
    %c0_i32 = arith.constant 0 : i32
    return %arg0, %arg1 : i32, i32
  }
  func.func @transform_1(%arg0: i32, %arg1: i32) -> (i32, i32) {
    %c0_i32 = arith.constant 0 : i32
    %c0_i32_0 = arith.constant 0 : i32
    return %arg0, %c0_i32 : i32, i32
  }
  func.func @transform_2(%arg0: i32, %arg1: i32) -> (i32, i32, i32) {
    %c0_i32 = arith.constant 0 : i32
    %c0_i32_0 = arith.constant 0 : i32
    %c0_i32_1 = arith.constant 0 : i32
    return %arg0, %c0_i32, %c0_i32_0 : i32, i32, i32
  }
}

</mosaic_0001>

<bundles_post_ra>
// kernel: tpu_custom_call.1
= control target key start
LH: loop header
LB: loop body
LE: loop exit
PB: predicated region body
PF: predicated region fallthrough
CT: control target
= control target key end

     0   :  { %s215_s0 = inlined_call_operand.vmem [shape: f32[16,32], index: 0, kind: input, shape index: {}]   ;;  %s216_s1 = inlined_call_operand.vmem [shape: f32[16,2], index: 1, kind: input, shape index: {}]   ;;  %s217_s2 = inlined_call_operand.hbm [shape: f32[1,8,128], index: 2, kind: output, shape index: {}]  }
   0x1   :  { %v14_v0 = vld [vmem:[%s216_s1] sm:$0xff]  ;;  %v15_v1 = vld [vmem:[%s216_s1 + $0x8] sm:$0xff] }
   0x2   :  { %7 = vsyncpa [#allocation3], 0  ;;  %v177_v2 = vmov 0   ;;  %vm133_vm0 = vcmp.lt.s32.totalorder %v14_v0, 0  ;;  %v134_v3 = vceil.f32 %v14_v0  ;;  %v135_v4 = vfloor.f32 %v14_v0  ;;  %s178_s13 = smov 127   ;;  %v12_v13 = vld [vmem:[%s215_s0] sm:$0xff] }
   0x3   :  { %150 = vset.pattern.permute.xlu0 %v177_v2  ;;  %v139_v6 = vceil.f32 %v15_v1  ;;  %v140_v7 = vfloor.f32 %v15_v1  ;;  %vm138_vm1 = vcmp.lt.s32.totalorder %v15_v1, 0  ;;  %v27_v11 = vlaneseq  ;;  %v13_v17 = vld [vmem:[%s215_s0 + $0x8] sm:$0xff]  ;;  %s179_s0 = smov [#allocation2]   ;;  %s124_s20 = sshll.u32 %s217_s2, 4  ;;  %s125_s20 = int_to_ptr.hbm [resolvable:$true] %s124_s20 }
   0x4   :  { %v136_v5 = vsel %vm133_vm0, %v134_v3, %v135_v4  ;;  %vm42_vm2 = vcmask 261120   ;;  %vm63_vm5 = vcmask 7168   ;;  %s122_s17 = sshll.u32 %s179_s0, 4  ;;  %s123_s17 = int_to_ptr.vmem [resolvable:$true] %s122_s17 }
   0x5   :  { %v137_v8 = vcvt.f32.s32 %v136_v5  ;;  %v141_v9 = vsel %vm138_vm1, %v139_v6, %v140_v7  ;;  %v201_v12 = vand.u32 127, %v27_v11 }
   0x6   :  { %v142_v10 = vcvt.f32.s32 %v141_v9 }
   0x7   :  { %33 = vperm.xlu0 %150, %v137_v8   ;;  %vm102_vm6 = vcmp.lt.s32.totalorder %v201_v12, 64 }
   0xf   :  { %36 = vperm.xlu0 %150, %v142_v10  }
  0x17   :  { %80 = vrot.lane.b32.xlu0 %v14_v0, %s178_s13 }
  0x79   :  { %v34_v14 = vpop.permute.xlu0 %33 }
  0x7a   :  { %vm38_vm3 = vcmp.eq.s32.totalorder %v201_v12, %v34_v14 }
  0x7b   :  { %v40_v15 = vsel %vm38_vm3, %v12_v13, 0.0 }
  0x7c   :  { %v43_v16 = vsel %vm42_vm2, %v40_v15, 0.0 }
  0x7d   :  { %44 = vadd.xlane.f32.xlu1 %v43_v16 }
  0x81   :  { %v37_v18 = vpop.permute.xlu0 %36 }
  0x82   :  { %vm39_vm4 = vcmp.eq.s32.totalorder %v201_v12, %v37_v18 }
  0x83   :  { %v41_v19 = vsel %vm39_vm4, %v13_v17, 0.0 }
  0x84   :  { %v46_v20 = vsel %vm42_vm2, %v41_v19, 0.0 }
  0x85   :  { %47 = vadd.xlane.f32.xlu1 %v46_v20 }
  0x89   :  { %v81_v27 = vpop.permute.xlu0 %80 }
  0x8a   :  { %v86_v29 = vsel %vm63_vm5, %v81_v27, 0.0 }
  0x9e   :  { %82 = vrot.lane.b32.xlu1 %v15_v1, %s178_s13 }
  0xf0   :  { %v45_v21 = vpop.xlane.xlu1 %44 }
  0xf1   :  { %v49_v22 = vsub.f32 0.0, %v45_v21 }
  0xf3   :  { %v51_v23 = vmul.f32 %v49_v22, %v14_v0 }
  0xf5   :  { %57 = vrot.lane.b32.xlu2 %v51_v23, %s178_s13 }
  0xf8   :  { %v48_v24 = vpop.xlane.xlu1 %47 }
  0xf9   :  { %v50_v25 = vsub.f32 0.0, %v48_v24 }
  0xfb   :  { %v52_v26 = vmul.f32 %v50_v25, %v15_v1 }
  0xfd   :  { %59 = vrot.lane.b32.xlu2 %v52_v26, %s178_s13 }
 0x110   :  { %v83_v28 = vpop.permute.xlu1 %82 }
 0x111   :  { %v87_v30 = vsel %vm63_vm5, %v83_v28, 0.0 }
 0x112   :  { %v88_v31 = vadd.f32 %v87_v30, %v86_v29 }
 0x114   :  { %89 = vadd.xlane.f32.xlu0 %v88_v31 }
 0x14f   :  { %v58_v32 = vpop.permute.xlu2 %57 }
 0x150   :  { %v64_v34 = vsel %vm63_vm5, %v58_v32, 0.0 }
 0x157   :  { %v60_v33 = vpop.permute.xlu2 %59 }
 0x158   :  { %v65_v35 = vsel %vm63_vm5, %v60_v33, 0.0 }
 0x159   :  { %v66_v36 = vadd.f32 %v65_v35, %v64_v34 }
 0x15b   :  { %67 = vadd.xlane.f32.xlu2 %v66_v36 }
 0x187   :  { %v90_v37 = vpop.xlane.xlu0 %89 }
 0x188   :  { %v91_v38 = vrot.slane %v90_v37, 4 }
 0x18a   :  { %v92_v39 = vadd.f32 %v91_v38, %v90_v37 }
 0x18c   :  { %v93_v40 = vrot.slane %v92_v39, 2 }
 0x18e   :  { %v94_v44 = vadd.f32 %v93_v40, %v92_v39 }
 0x190   :  { %v95_v47 = vrot.slane %v94_v44, 1 }
 0x192   :  { %v96_v50 = vadd.f32 %v95_v47, %v94_v44 }
 0x1ce   :  { %v68_v41 = vpop.xlane.xlu2 %67 }
 0x1cf   :  { %v69_v42 = vrot.slane %v68_v41, 4 }
 0x1d1   :  { %v70_v43 = vadd.f32 %v69_v42, %v68_v41 }
 0x1d3   :  { %v71_v45 = vrot.slane %v70_v43, 2 }
 0x1d5   :  { %v72_v46 = vadd.f32 %v71_v45, %v70_v43 }
 0x1d7   :  { %v73_v48 = vrot.slane %v72_v46, 1 }
 0x1d9   :  { %v74_v49 = vadd.f32 %v73_v48, %v72_v46 }
 0x1db   :  { %143 = vpush %v74_v49 }
 0x1dc   :  { %145 = vpush %v96_v50 }
 0x20c   :  { %s144_s21 = spop %143 }
 0x20d   :  { %v103_v51 = vstv %s144_s21  ;;  %s146_s22 = spop %145 }
 0x20e   :  { %v104_v52 = vstv %s146_s22 }
 0x20f   :  { %v105_v53 = vsel %vm102_vm6, %v103_v51, %v104_v52 }
 0x210   :  { %106 = vst [vmem:[#allocation2] sm:$0xff] %v105_v53 }
 0x211   :  { %127 = dma.vmem_to_hbm [thread:$0]  %s123_s17, 128, %s125_s20, [#allocation3]  }
 0x212   :  { %175 = dma.done.wait [#allocation3], 128  }
 0x213   :  { %176 = vsyncadd [#allocation3], 4294967168 }
 0x214   :  { %132 = vsyncpa [#allocation3], 1 }

</bundles_post_ra>
